<compile_context>
chip_gen: v5e
topology: v5e:2x2
jax: 0.10.0
libtpu: 0.0.40
codegen_flags: <defaults>
</compile_context>

<pallas_src>
import functools

import jax
import jax.numpy as jnp
from jax.experimental import pallas as pl
from jax.experimental.pallas import tpu as pltpu


def _layer_kernel(xg_ref, taps_ref, b1_ref, wpw_ref, b2_ref, out_ref, *,
                  stride, c_in, mxu_dtype):
    """Fused depthwise-3x3 + BN1 + ReLU + pointwise-1x1 + BN2 + ReLU (lane-dense).

      xg_ref : (nb, 3, ht, (W+2)*Cin)  stride==1: padded rows gathered per dy
               (nb, 9, ht, Wout*Cin)   stride>1 : rows gathered per (dy, dx)
      taps_ref: (9, Wout*Cin)          depthwise taps (BN1 scale folded), tiled over W
      b1_ref : (1, Wout*Cin)           BN1 bias, tiled over W
      wpw_ref: (Wout*Cin, Wout*Cout)   block-diagonal pointwise weights (BN2 scale folded)
      b2_ref : (1, Wout*Cout)          BN2 bias, tiled over W
      out_ref: (nb, ht, Wout*Cout)     lane-dense output tile
    """
    nb, ht, lanes_out = out_ref.shape
    lanes_mid = b1_ref.shape[-1]
    m = nb * ht

    xg = xg_ref[...]                       # f32 activations
    taps = taps_ref[...]                   # (9, lanes_mid) f32

    # Depthwise 3x3 (+ BN1 scale): 9 lane-dense VPU FMAs; no MXU, no big weight DMA.
    acc = jnp.zeros((m, lanes_mid), jnp.float32)
    for dy in range(3):
        if stride == 1:
            row = xg[:, dy].reshape(m, xg.shape[-1])          # (m, (W+2)*Cin)
            for dx in range(3):
                t = 3 * dy + dx
                acc = acc + row[:, dx * c_in:dx * c_in + lanes_mid] * taps[t:t + 1, :]
        else:
            for dx in range(3):
                t = 3 * dy + dx
                acc = acc + xg[:, t].reshape(m, lanes_mid) * taps[t:t + 1, :]

    # BN1 bias + ReLU (full 128-lane VPU work on the f32 accumulator).
    h1 = jnp.maximum(acc + b1_ref[...], 0.0)                  # (m, lanes_mid)

    # Pointwise 1x1 (+ BN2 scale): block-diagonal lane-dense MXU matmul
    # (bf16 operands by default, f32 accumulation).
    h2 = jnp.dot(h1.astype(mxu_dtype), wpw_ref[...],
                 preferred_element_type=jnp.float32)          # (m, lanes_out)

    # BN2 bias + ReLU, unmasked lane-dense store (lanes_out is a multiple of 128 here).
    h2 = jnp.maximum(h2 + b2_ref[...], 0.0)
    out_ref[...] = h2.reshape(nb, ht, lanes_out).astype(out_ref.dtype)


def mobilenet_layer(x_nchw, w_dw, gamma1, beta1, mean1, var1,
                    w_pw, gamma2, beta2, mean2, var2, *,
                    stride=1, eps=1e-5, mxu_dtype=jnp.bfloat16,
                    out_dtype=jnp.float32):
    """Forward pass of the MobileNet Layer (inference-mode BatchNorm).

    Accepts / returns PyTorch-style NCHW; the Pallas kernel runs in a lane-dense
    (rows, W*C) layout.
    """
    n, c_in, h, w = x_nchw.shape
    c_out = w_pw.shape[0]
    h_out = (h + 2 - 3) // stride + 1
    w_out = (w + 2 - 3) // stride + 1
    hp, wp = h + 2, w + 2
    k_in = wp * c_in              # padded-row lane width (stride == 1 path)
    lanes_mid = w_out * c_in      # lane width between the two convs
    lanes_out = w_out * c_out     # output lane width
    f32 = jnp.float32

    # ---- fold BatchNorms (inference mode) into per-channel scale/bias ----
    # TODO(synk): training-mode BatchNorm (batch statistics / running-stat updates) is
    # not fused; this implements the eval-mode forward.
    s1 = gamma1 / jnp.sqrt(var1 + eps)
    b1 = beta1 - mean1 * s1
    s2 = gamma2 / jnp.sqrt(var2 + eps)
    b2 = beta2 - mean2 * s2

    planes_cnt = 3 if stride == 1 else 9
    k_last = k_in if stride == 1 else lanes_mid

    # ---- tiling policy: >=2 parallel grid steps (v7x 2nd TensorCore + DMA pipelining),
    # a few hundred M-rows per step at most, explicit VMEM budget (v5e-safe) ----
    if h_out >= 16:
        ht = pl.cdiv(h_out, 2)
        ht = pl.cdiv(ht, 8) * 8            # keep the sublane tile dim a multiple of 8
    else:
        ht = h_out
    nb = max(1, min(n, max(1, 256 // max(ht, 1))))
    if n >= 2:
        nb = min(nb, pl.cdiv(n, 2))        # at least 2 batch tiles when n >= 2

    def _vmem_est(nb_, ht_):
        act_in = nb_ * planes_cnt * ht_ * k_last * 4
        out_blk = nb_ * ht_ * lanes_out * jnp.dtype(out_dtype).itemsize
        wts = (9 * lanes_mid + lanes_mid + lanes_out) * 4 \
            + lanes_mid * lanes_out * jnp.dtype(mxu_dtype).itemsize
        return 2 * (act_in + out_blk + wts)   # double-buffered pipeline blocks

    VMEM_BUDGET = 12 * 1024 * 1024            # conservative: v5e default scoped ~16 MiB
    while _vmem_est(nb, ht) > VMEM_BUDGET and (nb > 1 or ht > 8):
        if nb > 1:
            nb = pl.cdiv(nb, 2)
        else:
            ht = max(8, pl.cdiv(max(ht // 2, 1), 8) * 8)
    # TODO(synk): if a config still exceeds the budget, raise it explicitly via
    # pltpu.CompilerParams(vmem_limit_bytes=...) instead of assuming 128 MiB.

    n_b = pl.cdiv(n, nb)
    n_pad = n_b * nb
    n_ht = pl.cdiv(h_out, ht)
    hpad = n_ht * ht

    # ---- input: NCHW -> NHWC, zero-pad; gather the dy rows (and full dy/dx taps for
    # stride > 1) in the wrapper so the kernel never does strided sublane slices ----
    xpad = jnp.pad(jnp.transpose(x_nchw, (0, 2, 3, 1)).astype(f32),
                   ((0, 0), (1, 1), (1, 1), (0, 0)))          # (n, hp, wp, c_in)
    if stride == 1:
        xrow = xpad.reshape(n, hp, k_in)
        xg = jnp.stack([xrow[:, dy:dy + h_out, :] for dy in range(3)], axis=1)
    else:
        planes = []
        for dy in range(3):
            for dx in range(3):
                sub = xpad[:, dy:dy + (h_out - 1) * stride + 1:stride,
                              dx:dx + (w_out - 1) * stride + 1:stride, :]
                planes.append(sub.reshape(n, h_out, lanes_mid))
        xg = jnp.stack(planes, axis=1)                        # (n, 9, h_out, lanes_mid)
    xg = jnp.pad(xg, ((0, n_pad - n), (0, 0), (0, hpad - h_out), (0, 0)))

    # ---- depthwise taps (BN1 scale folded), tiled across W (lane-dense) ----
    wdw = w_dw[:, 0, :, :].astype(f32) * s1[:, None, None]    # (c_in, 3, 3)
    taps = jnp.stack([jnp.tile(wdw[:, dy, dx], w_out)
                      for dy in range(3) for dx in range(3)], axis=0)   # (9, lanes_mid)

    # ---- pointwise weights (BN2 scale folded) as a block-diagonal bf16 matrix ----
    wpw = jnp.transpose(w_pw[:, :, 0, 0], (1, 0)).astype(f32) * s2[None, :]  # (c_in, c_out)
    w_big = jnp.kron(jnp.eye(w_out, dtype=f32), wpw).astype(mxu_dtype)

    # ---- per-channel biases, tiled across W to match the lane-dense layout ----
    b1_t = jnp.tile(b1.astype(f32), w_out)[None, :]           # (1, lanes_mid)
    b2_t = jnp.tile(b2.astype(f32), w_out)[None, :]           # (1, lanes_out)

    kernel = functools.partial(_layer_kernel, stride=stride, c_in=c_in,
                               mxu_dtype=mxu_dtype)

    out = pl.pallas_call(
        kernel,
        out_shape=jax.ShapeDtypeStruct((n_pad, hpad, lanes_out), out_dtype),
        grid_spec=pltpu.PrefetchScalarGridSpec(
            num_scalar_prefetch=0,
            grid=(n_b, n_ht),
            in_specs=[
                pl.BlockSpec((nb, planes_cnt, ht, k_last), lambda b, hi: (b, 0, hi, 0)),
                pl.BlockSpec((9, lanes_mid), lambda b, hi: (0, 0)),
                pl.BlockSpec((1, lanes_mid), lambda b, hi: (0, 0)),
                pl.BlockSpec((lanes_mid, lanes_out), lambda b, hi: (0, 0)),
                pl.BlockSpec((1, lanes_out), lambda b, hi: (0, 0)),
            ],
            out_specs=pl.BlockSpec((nb, ht, lanes_out), lambda b, hi: (b, hi, 0)),
        ),
        compiler_params=pltpu.CompilerParams(
            dimension_semantics=("parallel", "parallel")),
    )(xg, taps, b1_t, w_big, b2_t)

    # lane-dense (N, Hout, Wout*Cout) -> NCHW to match the PyTorch convention.
    # TODO(synk): in an end-to-end pipeline keep the lane-dense / NHWC layout between
    # layers instead of converting on both sides of every call.
    out = out[:n, :h_out, :].reshape(n, h_out, w_out, c_out)
    return jnp.transpose(out, (0, 3, 1, 2))


def _reference(x_nchw, w_dw, s1, b1, w_pw, s2, b2, stride):
    """Pure-JAX reference (lax convolutions) for correctness checking."""
    y = jax.lax.conv_general_dilated(
        x_nchw, w_dw, window_strides=(stride, stride),
        padding=((1, 1), (1, 1)),
        dimension_numbers=('NCHW', 'OIHW', 'NCHW'),
        feature_group_count=x_nchw.shape[1])
    y = y * s1[None, :, None, None] + b1[None, :, None, None]
    y = jnp.maximum(y, 0.0)
    z = jax.lax.conv_general_dilated(
        y, w_pw, window_strides=(1, 1), padding='VALID',
        dimension_numbers=('NCHW', 'OIHW', 'NCHW'))
    z = z * s2[None, :, None, None] + b2[None, :, None, None]
    return jnp.maximum(z, 0.0)


if __name__ == "__main__":
    # Small shapes consistent with the module: batch=2, in_planes=8, planes=16,
    # spatial 16x16, stride=1.  (Wout*Cin = 128, Wout*Cout = 256 -> lane-aligned.)
    N, C_IN, C_OUT, H, W = 2, 8, 16, 16, 16
    STRIDE = 1
    EPS = 1e-5

    key = jax.random.PRNGKey(0)
    keys = jax.random.split(key, 12)

    x = jax.random.normal(keys[0], (N, C_IN, H, W), jnp.float32)
    w_dw = 0.3 * jax.random.normal(keys[1], (C_IN, 1, 3, 3), jnp.float32)
    gamma1 = 1.0 + 0.1 * jax.random.normal(keys[2], (C_IN,), jnp.float32)
    beta1 = 0.1 * jax.random.normal(keys[3], (C_IN,), jnp.float32)
    mean1 = 0.1 * jax.random.normal(keys[4], (C_IN,), jnp.float32)
    var1 = 0.5 + jnp.abs(jax.random.normal(keys[5], (C_IN,), jnp.float32))
    w_pw = 0.3 * jax.random.normal(keys[6], (C_OUT, C_IN, 1, 1), jnp.float32)
    gamma2 = 1.0 + 0.1 * jax.random.normal(keys[7], (C_OUT,), jnp.float32)
    beta2 = 0.1 * jax.random.normal(keys[8], (C_OUT,), jnp.float32)
    mean2 = 0.1 * jax.random.normal(keys[9], (C_OUT,), jnp.float32)
    var2 = 0.5 + jnp.abs(jax.random.normal(keys[10], (C_OUT,), jnp.float32))

    h_out = (H + 2 - 3) // STRIDE + 1
    w_out = (W + 2 - 3) // STRIDE + 1

    layer_f32 = jax.jit(functools.partial(
        mobilenet_layer, stride=STRIDE, eps=EPS, mxu_dtype=jnp.float32))
    layer_bf16 = jax.jit(functools.partial(
        mobilenet_layer, stride=STRIDE, eps=EPS, mxu_dtype=jnp.bfloat16))

    out_f32 = jax.block_until_ready(layer_f32(
        x, w_dw, gamma1, beta1, mean1, var1, w_pw, gamma2, beta2, mean2, var2))
    out_bf16 = jax.block_until_ready(layer_bf16(
        x, w_dw, gamma1, beta1, mean1, var1, w_pw, gamma2, beta2, mean2, var2))

    # Correctness check against a pure-JAX reference (inference-mode folded BN).
    s1 = gamma1 / jnp.sqrt(var1 + EPS)
    b1 = beta1 - mean1 * s1
    s2 = gamma2 / jnp.sqrt(var2 + EPS)
    b2 = beta2 - mean2 * s2
    ref = _reference(x, w_dw, s1, b1, w_pw, s2, b2, STRIDE)

    assert out_f32.shape == (N, C_OUT, h_out, w_out)
    # f32 path: depthwise is exact f32 VPU FMAs; pointwise matmul uses default TPU
    # matmul precision (tolerance absorbs possible bf16-pass decomposition).
    assert jnp.allclose(out_f32, ref, atol=2e-3, rtol=2e-3), \
        float(jnp.max(jnp.abs(out_f32 - ref)))
    # bf16 MXU operands on the pointwise matmul -> looser tolerance vs. the f32 ref.
    assert jnp.allclose(out_bf16, ref, atol=1e-1, rtol=5e-2), \
        float(jnp.max(jnp.abs(out_bf16 - ref)))

    print("KERNEL_OK")
</pallas_src>

<mosaic_0001>
module attributes {stable_mosaic.version = 11 : i64} {
  func.func @_layer_kernel(%arg0: i32, %arg1: i32, %arg2: memref<1x3x8x144xf32, #tpu.memory_space<vmem>>, %arg3: memref<9x128xf32, #tpu.memory_space<vmem>>, %arg4: memref<1x128xf32, #tpu.memory_space<vmem>>, %arg5: memref<128x256xf32, #tpu.memory_space<vmem>>, %arg6: memref<1x256xf32, #tpu.memory_space<vmem>>, %arg7: memref<1x8x256xf32, #tpu.memory_space<vmem>>) attributes {dimension_semantics = [#tpu.dimension_semantics<parallel>, #tpu.dimension_semantics<parallel>], iteration_bounds = array<i64: 2, 2>, scalar_prefetch = 0 : i64, scratch_operands = 0 : i64, tpu.core_type = #tpu.core_type<tc>, window_params = [{transform_indices = @transform_0, window_bounds = array<i64: 1, 3, 8, 144>}, {pipeline_mode = #tpu.pipeline_mode<synchronous>, transform_indices = @transform_1, window_bounds = array<i64: 9, 128>}, {pipeline_mode = #tpu.pipeline_mode<synchronous>, transform_indices = @transform_2, window_bounds = array<i64: 1, 128>}, {pipeline_mode = #tpu.pipeline_mode<synchronous>, transform_indices = @transform_3, window_bounds = array<i64: 128, 256>}, {pipeline_mode = #tpu.pipeline_mode<synchronous>, transform_indices = @transform_4, window_bounds = array<i64: 1, 256>}, {transform_indices = @transform_5, window_bounds = array<i64: 1, 8, 256>}]} {
    %c0 = arith.constant 0 : index
    %c0_0 = arith.constant 0 : index
    %c0_1 = arith.constant 0 : index
    %c0_2 = arith.constant 0 : index
    %0 = vector.load %arg2[%c0, %c0_0, %c0_1, %c0_2] : memref<1x3x8x144xf32, #tpu.memory_space<vmem>>, vector<1x3x8x144xf32>
    %c0_3 = arith.constant 0 : index
    %c0_4 = arith.constant 0 : index
    %1 = vector.load %arg3[%c0_3, %c0_4] : memref<9x128xf32, #tpu.memory_space<vmem>>, vector<9x128xf32>
    %cst = arith.constant 0.000000e+00 : f32
    %2 = vector.broadcast %cst : f32 to vector<8x128xf32>
    %3 = vector.extract_strided_slice %0 {offsets = [0, 0, 0, 0], sizes = [1, 1, 8, 144], strides = [1, 1, 1, 1]} : vector<1x3x8x144xf32> to vector<1x1x8x144xf32>
    %4 = vector.shape_cast %3 : vector<1x1x8x144xf32> to vector<1x8x144xf32>
    %5 = vector.shape_cast %4 : vector<1x8x144xf32> to vector<8x144xf32>
    %6 = vector.extract_strided_slice %5 {offsets = [0, 0], sizes = [8, 128], strides = [1, 1]} : vector<8x144xf32> to vector<8x128xf32>
    %7 = vector.extract_strided_slice %1 {offsets = [0, 0], sizes = [1, 128], strides = [1, 1]} : vector<9x128xf32> to vector<1x128xf32>
    %8 = vector.broadcast %7 : vector<1x128xf32> to vector<8x128xf32>
    %9 = arith.mulf %6, %8 : vector<8x128xf32>
    %10 = arith.addf %2, %9 : vector<8x128xf32>
    %11 = vector.extract_strided_slice %5 {offsets = [0, 8], sizes = [8, 128], strides = [1, 1]} : vector<8x144xf32> to vector<8x128xf32>
    %12 = vector.extract_strided_slice %1 {offsets = [1, 0], sizes = [1, 128], strides = [1, 1]} : vector<9x128xf32> to vector<1x128xf32>
    %13 = vector.broadcast %12 : vector<1x128xf32> to vector<8x128xf32>
    %14 = arith.mulf %11, %13 : vector<8x128xf32>
    %15 = arith.addf %10, %14 : vector<8x128xf32>
    %16 = vector.extract_strided_slice %5 {offsets = [0, 16], sizes = [8, 128], strides = [1, 1]} : vector<8x144xf32> to vector<8x128xf32>
    %17 = vector.extract_strided_slice %1 {offsets = [2, 0], sizes = [1, 128], strides = [1, 1]} : vector<9x128xf32> to vector<1x128xf32>
    %18 = vector.broadcast %17 : vector<1x128xf32> to vector<8x128xf32>
    %19 = arith.mulf %16, %18 : vector<8x128xf32>
    %20 = arith.addf %15, %19 : vector<8x128xf32>
    %21 = vector.extract_strided_slice %0 {offsets = [0, 1, 0, 0], sizes = [1, 1, 8, 144], strides = [1, 1, 1, 1]} : vector<1x3x8x144xf32> to vector<1x1x8x144xf32>
    %22 = vector.shape_cast %21 : vector<1x1x8x144xf32> to vector<1x8x144xf32>
    %23 = vector.shape_cast %22 : vector<1x8x144xf32> to vector<8x144xf32>
    %24 = vector.extract_strided_slice %23 {offsets = [0, 0], sizes = [8, 128], strides = [1, 1]} : vector<8x144xf32> to vector<8x128xf32>
    %25 = vector.extract_strided_slice %1 {offsets = [3, 0], sizes = [1, 128], strides = [1, 1]} : vector<9x128xf32> to vector<1x128xf32>
    %26 = vector.broadcast %25 : vector<1x128xf32> to vector<8x128xf32>
    %27 = arith.mulf %24, %26 : vector<8x128xf32>
    %28 = arith.addf %20, %27 : vector<8x128xf32>
    %29 = vector.extract_strided_slice %23 {offsets = [0, 8], sizes = [8, 128], strides = [1, 1]} : vector<8x144xf32> to vector<8x128xf32>
    %30 = vector.extract_strided_slice %1 {offsets = [4, 0], sizes = [1, 128], strides = [1, 1]} : vector<9x128xf32> to vector<1x128xf32>
    %31 = vector.broadcast %30 : vector<1x128xf32> to vector<8x128xf32>
    %32 = arith.mulf %29, %31 : vector<8x128xf32>
    %33 = arith.addf %28, %32 : vector<8x128xf32>
    %34 = vector.extract_strided_slice %23 {offsets = [0, 16], sizes = [8, 128], strides = [1, 1]} : vector<8x144xf32> to vector<8x128xf32>
    %35 = vector.extract_strided_slice %1 {offsets = [5, 0], sizes = [1, 128], strides = [1, 1]} : vector<9x128xf32> to vector<1x128xf32>
    %36 = vector.broadcast %35 : vector<1x128xf32> to vector<8x128xf32>
    %37 = arith.mulf %34, %36 : vector<8x128xf32>
    %38 = arith.addf %33, %37 : vector<8x128xf32>
    %39 = vector.extract_strided_slice %0 {offsets = [0, 2, 0, 0], sizes = [1, 1, 8, 144], strides = [1, 1, 1, 1]} : vector<1x3x8x144xf32> to vector<1x1x8x144xf32>
    %40 = vector.shape_cast %39 : vector<1x1x8x144xf32> to vector<1x8x144xf32>
    %41 = vector.shape_cast %40 : vector<1x8x144xf32> to vector<8x144xf32>
    %42 = vector.extract_strided_slice %41 {offsets = [0, 0], sizes = [8, 128], strides = [1, 1]} : vector<8x144xf32> to vector<8x128xf32>
    %43 = vector.extract_strided_slice %1 {offsets = [6, 0], sizes = [1, 128], strides = [1, 1]} : vector<9x128xf32> to vector<1x128xf32>
    %44 = vector.broadcast %43 : vector<1x128xf32> to vector<8x128xf32>
    %45 = arith.mulf %42, %44 : vector<8x128xf32>
    %46 = arith.addf %38, %45 : vector<8x128xf32>
    %47 = vector.extract_strided_slice %41 {offsets = [0, 8], sizes = [8, 128], strides = [1, 1]} : vector<8x144xf32> to vector<8x128xf32>
    %48 = vector.extract_strided_slice %1 {offsets = [7, 0], sizes = [1, 128], strides = [1, 1]} : vector<9x128xf32> to vector<1x128xf32>
    %49 = vector.broadcast %48 : vector<1x128xf32> to vector<8x128xf32>
    %50 = arith.mulf %47, %49 : vector<8x128xf32>
    %51 = arith.addf %46, %50 : vector<8x128xf32>
    %52 = vector.extract_strided_slice %41 {offsets = [0, 16], sizes = [8, 128], strides = [1, 1]} : vector<8x144xf32> to vector<8x128xf32>
    %53 = vector.extract_strided_slice %1 {offsets = [8, 0], sizes = [1, 128], strides = [1, 1]} : vector<9x128xf32> to vector<1x128xf32>
    %54 = vector.broadcast %53 : vector<1x128xf32> to vector<8x128xf32>
    %55 = arith.mulf %52, %54 : vector<8x128xf32>
    %56 = arith.addf %51, %55 : vector<8x128xf32>
    %c0_5 = arith.constant 0 : index
    %c0_6 = arith.constant 0 : index
    %57 = vector.load %arg4[%c0_5, %c0_6] : memref<1x128xf32, #tpu.memory_space<vmem>>, vector<1x128xf32>
    %58 = vector.broadcast %57 : vector<1x128xf32> to vector<8x128xf32>
    %59 = arith.addf %56, %58 : vector<8x128xf32>
    %cst_7 = arith.constant 0.000000e+00 : f32
    %60 = vector.broadcast %cst_7 : f32 to vector<8x128xf32>
    %61 = arith.maximumf %59, %60 : vector<8x128xf32>
    %c0_8 = arith.constant 0 : index
    %c0_9 = arith.constant 0 : index
    %62 = vector.load %arg5[%c0_8, %c0_9] : memref<128x256xf32, #tpu.memory_space<vmem>>, vector<128x256xf32>
    %cst_10 = arith.constant dense<0.000000e+00> : vector<8x256xf32>
    %63 = tpu.matmul %61, %62, %cst_10 {dimension_numbers = #tpu.dot_dimension_numbers<[1], [0], [0], [1], [0, 0, 1, 1], [], []>} : vector<8x128xf32>, vector<128x256xf32>, vector<8x256xf32> -> vector<8x256xf32>
    %c0_11 = arith.constant 0 : index
    %c0_12 = arith.constant 0 : index
    %64 = vector.load %arg6[%c0_11, %c0_12] : memref<1x256xf32, #tpu.memory_space<vmem>>, vector<1x256xf32>
    %65 = vector.broadcast %64 : vector<1x256xf32> to vector<8x256xf32>
    %66 = arith.addf %63, %65 : vector<8x256xf32>
    %cst_13 = arith.constant 0.000000e+00 : f32
    %67 = vector.broadcast %cst_13 : f32 to vector<8x256xf32>
    %68 = arith.maximumf %66, %67 : vector<8x256xf32>
    %69 = vector.shape_cast %68 : vector<8x256xf32> to vector<1x8x256xf32>
    %c0_14 = arith.constant 0 : index
    %c0_15 = arith.constant 0 : index
    %c0_16 = arith.constant 0 : index
    %70 = vector.load %arg7[%c0_14, %c0_15, %c0_16] : memref<1x8x256xf32, #tpu.memory_space<vmem>>, vector<1x8x256xf32>
    tpu.vector_store %arg7[%c0_14, %c0_15, %c0_16], %69 {strides = array<i32>} : memref<1x8x256xf32, #tpu.memory_space<vmem>>, vector<1x8x256xf32>,
    return
  }
  func.func @transform_0(%arg0: i32, %arg1: i32) -> (i32, i32, i32, i32) {
    %c0_i32 = arith.constant 0 : i32
    %c0_i32_0 = arith.constant 0 : i32
    %c0_i32_1 = arith.constant 0 : i32
    return %arg0, %c0_i32, %arg1, %c0_i32_0 : i32, i32, i32, i32
  }
  func.func @transform_1(%arg0: i32, %arg1: i32) -> (i32, i32) {
    %c0_i32 = arith.constant 0 : i32
    %c0_i32_0 = arith.constant 0 : i32
    %c0_i32_1 = arith.constant 0 : i32
    return %c0_i32, %c0_i32_0 : i32, i32
  }
  func.func @transform_2(%arg0: i32, %arg1: i32) -> (i32, i32) {
    %c0_i32 = arith.constant 0 : i32
    %c0_i32_0 = arith.constant 0 : i32
    %c0_i32_1 = arith.constant 0 : i32
    return %c0_i32, %c0_i32_0 : i32, i32
  }
  func.func @transform_3(%arg0: i32, %arg1: i32) -> (i32, i32) {
    %c0_i32 = arith.constant 0 : i32
    %c0_i32_0 = arith.constant 0 : i32
    %c0_i32_1 = arith.constant 0 : i32
    return %c0_i32, %c0_i32_0 : i32, i32
  }
  func.func @transform_4(%arg0: i32, %arg1: i32) -> (i32, i32) {
    %c0_i32 = arith.constant 0 : i32
    %c0_i32_0 = arith.constant 0 : i32
    %c0_i32_1 = arith.constant 0 : i32
    return %c0_i32, %c0_i32_0 : i32, i32
  }
  func.func @transform_5(%arg0: i32, %arg1: i32) -> (i32, i32, i32) {
    %c0_i32 = arith.constant 0 : i32
    %c0_i32_0 = arith.constant 0 : i32
    return %arg0, %arg1, %c0_i32 : i32, i32, i32
  }
}

</mosaic_0001>

<bundles_post_ra>
// kernel: tile.81
= control target key start
LH: loop header
LB: loop body
LE: loop exit
PB: predicated region body
PF: predicated region fallthrough
CT: control target
= control target key end

     0   :  { %s131_s10 = smov 120   ;;  %s132_s11 = smov 104   ;;  %vm3_vm0 = vcmask 64512   ;;  %vm9_vm1 = vcmask 1048512   ;;  %vm15_vm2 = vcmask 982912   ;;  %vm21_vm3 = vcmask 917312   ;;  %s207_s0 = inlined_call_operand.vmem [shape: f32[16,8], index: 0, kind: input, shape index: {}]   ;;  %s208_s1 = inlined_call_operand.vmem [shape: f32[1,128], index: 1, kind: output, shape index: {}]  }
   0x1   :  { %v101_v0 = vld [vmem:[%s207_s0 + $0xf] sm:$0x1]   ;;  %v103_v1 = vld [vmem:[%s207_s0 + $0xd] sm:$0x1]   ;;  %v105_v2 = vld [vmem:[%s207_s0 + $0xb] sm:$0x1]  }
   0x2   :  { %7 = vrot.lane.b32.xlu0 %v101_v0, %s131_s10  ;;  %19 = vrot.lane.b32.xlu1 %v103_v1, %s132_s11  ;;  %s133_s14 = smov 88   ;;  %v102_v3 = vld [vmem:[%s207_s0 + $0xe] sm:$0x1]   ;;  %v104_v4 = vld [vmem:[%s207_s0 + $0xc] sm:$0x1]   ;;  %s134_s19 = smov 112  }
   0x3   :  { %31 = vrot.lane.b32.xlu2 %v105_v2, %s133_s14  ;;  %s135_s20 = smov 96   ;;  %v106_v5 = vld [vmem:[%s207_s0 + $0xa] sm:$0x1]   ;;  %s136_s23 = smov 80   ;;  %v107_v6 = vld [vmem:[%s207_s0 + $0x9] sm:$0x1]  }
   0x4   :  { %v108_v7 = vld [vmem:[%s207_s0 + $0x8] sm:$0x1]   ;;  %s137_s28 = smov 72   ;;  %s138_s29 = smov 64   ;;  %v109_v8 = vld [vmem:[%s207_s0 + $0x7] sm:$0x1]  }
   0x5   :  { %s139_s3 = smov 56   ;;  %v110_v9 = vld [vmem:[%s207_s0 + $0x6] sm:$0x1]   ;;  %v111_v10 = vld [vmem:[%s207_s0 + $0x5] sm:$0x1]   ;;  %s140_s8 = smov 48  }
   0x6   :  { %s141_s9 = smov 40   ;;  %v112_v11 = vld [vmem:[%s207_s0 + $0x4] sm:$0x1]   ;;  %s142_s12 = smov 32   ;;  %v113_v12 = vld [vmem:[%s207_s0 + $0x3] sm:$0x1]  }
   0x7   :  { %v114_v13 = vld [vmem:[%s207_s0 + $0x2] sm:$0x1]   ;;  %s143_s17 = smov 24   ;;  %s144_s18 = smov 16   ;;  %v115_v14 = vld [vmem:[%s207_s0 + $0x1] sm:$0x1]  }
   0x8   :  { %s145_s21 = smov 8   ;;  %v2_v15 = vld [vmem:[%s207_s0] sm:$0x1]   ;;  %vm27_vm4 = vcmask 851712   ;;  %vm33_vm5 = vcmask 786112   ;;  %vm39_vm6 = vcmask 720512  }
   0x9   :  { %4 = vst.msk [vmem:[#allocation0] sm:$0x1] %vm3_vm0, %v2_v15   ;;  %vm45_vm7 = vcmask 654912   ;;  %vm51_vm8 = vcmask 589312   ;;  %vm57_vm9 = vcmask 523712   ;;  %vm63_vm10 = vcmask 458112  }
   0xa   :  { %13 = vrot.lane.b32.xlu0 %v102_v3, %s134_s19  ;;  %25 = vrot.lane.b32.xlu1 %v104_v4, %s135_s20  ;;  %vm69_vm11 = vcmask 392512   ;;  %vm75_vm12 = vcmask 326912   ;;  %vm81_vm13 = vcmask 261312   ;;  %vm87_vm14 = vcmask 195712  }
   0xb   :  { %37 = vrot.lane.b32.xlu2 %v106_v5, %s136_s23  ;;  %vm93_vm15 = vcmask 130112  }
  0x12   :  { %43 = vrot.lane.b32.xlu0 %v107_v6, %s137_s28  ;;  %49 = vrot.lane.b32.xlu1 %v108_v7, %s138_s29 }
  0x13   :  { %55 = vrot.lane.b32.xlu2 %v109_v8, %s139_s3 }
  0x1a   :  { %61 = vrot.lane.b32.xlu0 %v110_v9, %s140_s8  ;;  %67 = vrot.lane.b32.xlu1 %v111_v10, %s141_s9 }
  0x1b   :  { %73 = vrot.lane.b32.xlu2 %v112_v11, %s142_s12 }
  0x22   :  { %79 = vrot.lane.b32.xlu0 %v113_v12, %s143_s17  ;;  %85 = vrot.lane.b32.xlu1 %v114_v13, %s144_s18 }
  0x23   :  { %91 = vrot.lane.b32.xlu2 %v115_v14, %s145_s21 }
  0x5d   :  { %v32_v16 = vpop.permute.xlu2 %31  }
  0x65   :  { %v38_v17 = vpop.permute.xlu2 %37  }
  0x6d   :  { %v56_v18 = vpop.permute.xlu2 %55  }
  0x74   :  { %v8_v19 = vpop.permute.xlu0 %7   ;;  %v20_v20 = vpop.permute.xlu1 %19  }
  0x75   :  { %10 = vst.msk [vmem:[#allocation0] sm:$0x1] %vm9_vm1, %v8_v19   ;;  %v74_v21 = vpop.permute.xlu2 %73  }
  0x7c   :  { %v14_v22 = vpop.permute.xlu0 %13   ;;  %v26_v23 = vpop.permute.xlu1 %25  }
  0x7d   :  { %16 = vst.msk [vmem:[#allocation0] sm:$0x1] %vm15_vm2, %v14_v22   ;;  %v92_v24 = vpop.permute.xlu2 %91  }
  0x7e   :  { %22 = vst.msk [vmem:[#allocation0] sm:$0x1] %vm21_vm3, %v20_v20  }
  0x7f   :  { %28 = vst.msk [vmem:[#allocation0] sm:$0x1] %vm27_vm4, %v26_v23  }
  0x80   :  { %34 = vst.msk [vmem:[#allocation0] sm:$0x1] %vm33_vm5, %v32_v16  }
  0x81   :  { %40 = vst.msk [vmem:[#allocation0] sm:$0x1] %vm39_vm6, %v38_v17  }
  0x84   :  { %v44_v25 = vpop.permute.xlu0 %43   ;;  %v50_v26 = vpop.permute.xlu1 %49  }
  0x85   :  { %46 = vst.msk [vmem:[#allocation0] sm:$0x1] %vm45_vm7, %v44_v25  }
  0x86   :  { %52 = vst.msk [vmem:[#allocation0] sm:$0x1] %vm51_vm8, %v50_v26  }
  0x87   :  { %58 = vst.msk [vmem:[#allocation0] sm:$0x1] %vm57_vm9, %v56_v18  }
  0x8c   :  { %v62_v27 = vpop.permute.xlu0 %61   ;;  %v68_v28 = vpop.permute.xlu1 %67  }
  0x8d   :  { %64 = vst.msk [vmem:[#allocation0] sm:$0x1] %vm63_vm10, %v62_v27  }
  0x8e   :  { %70 = vst.msk [vmem:[#allocation0] sm:$0x1] %vm69_vm11, %v68_v28  }
  0x8f   :  { %76 = vst.msk [vmem:[#allocation0] sm:$0x1] %vm75_vm12, %v74_v21  }
  0x94   :  { %v80_v29 = vpop.permute.xlu0 %79   ;;  %v86_v30 = vpop.permute.xlu1 %85  }
  0x95   :  { %82 = vst.msk [vmem:[#allocation0] sm:$0x1] %vm81_vm13, %v80_v29  }
  0x96   :  { %88 = vst.msk [vmem:[#allocation0] sm:$0x1] %vm87_vm14, %v86_v30  }
  0x97   :  { %94 = vst.msk [vmem:[#allocation0] sm:$0x1] %vm93_vm15, %v92_v24  }
  0x9e   :  { %v97_v31 = vld [vmem:[#allocation0] sm:$0x1] }
  0x9f   :  { %100 = vst [vmem:[%s208_s1] sm:$0x1] %v97_v31 }

// kernel: tile.72
= control target key start
LH: loop header
LB: loop body
LE: loop exit
PB: predicated region body
PF: predicated region fallthrough
CT: control target
= control target key end

     0   :  { %s28_s0 = inlined_call_operand.vmem [shape: f32[8], index: 0, kind: input, shape index: {}]   ;;  %s29_s1 = inlined_call_operand.vmem [shape: f32[16,8], index: 1, kind: output, shape index: {}]  }
   0x1   :  { %v4_v0 = vld [vmem:[%s28_s0] ss:$0 sm:$0xff] }
   0x2   :  { %5 = vst [vmem:[%s29_s1] sm:$0xff] %v4_v0 }
   0x3   :  { %8 = vst [vmem:[%s29_s1 + $0x8] sm:$0xff] %v4_v0 }

// kernel: tile.90
= control target key start
LH: loop header
LB: loop body
LE: loop exit
PB: predicated region body
PF: predicated region fallthrough
CT: control target
= control target key end

     0   :  { %s28_s0 = inlined_call_operand.vmem [shape: f32[16], index: 0, kind: input, shape index: {}]   ;;  %s29_s1 = inlined_call_operand.vmem [shape: f32[16,16], index: 1, kind: output, shape index: {}]  }
   0x1   :  { %v4_v0 = vld [vmem:[%s28_s0] ss:$0 sm:$0xff] }
   0x2   :  { %5 = vst [vmem:[%s29_s1] sm:$0xff] %v4_v0 }
   0x3   :  { %8 = vst [vmem:[%s29_s1 + $0x8] sm:$0xff] %v4_v0 }

// kernel: tile.91
= control target key start
LH: loop header
LB: loop body
LE: loop exit
PB: predicated region body
PF: predicated region fallthrough
CT: control target
= control target key end

     0   :  { %s7_s6 = smov 3  ;;  %s21_s9 = smov 3  ;;  %vm4_vm0 = vcmask 130048   ;;  %vm11_vm1 = vcmask 1048448   ;;  %vm18_vm2 = vcmask 917248   ;;  %vm25_vm3 = vcmask 786048   ;;  %s129_s0 = inlined_call_operand.vmem [shape: f32[16,16], index: 0, kind: input, shape index: {}]   ;;  %s130_s1 = inlined_call_operand.vmem [shape: f32[1,256], index: 1, kind: output, shape index: {}]  }
   0x1   :  { %v67_v0 = vld [vmem:[%s129_s0 + $0x7] ss:$8 sm:%s7_s6]   ;;  %s82_s10 = smov 112   ;;  %v69_v1 = vld [vmem:[%s129_s0 + $0x5] ss:$8 sm:%s21_s9]   ;;  %s83_s13 = smov 80  }
   0x2   :  { %9 = vrot.lane.b32.xlu0 %v67_v0, %s82_s10  ;;  %23 = vrot.lane.b32.xlu1 %v69_v1, %s83_s13  ;;  %s14_s14 = smov 3  ;;  %s28_s15 = smov 3  ;;  %vm32_vm4 = vcmask 654848   ;;  %vm39_vm5 = vcmask 523648   ;;  %vm46_vm6 = vcmask 392448   ;;  %vm53_vm7 = vcmask 261248  }
   0x3   :  { %s35_s16 = smov 3  ;;  %v68_v3 = vld [vmem:[%s129_s0 + $0x6] ss:$8 sm:%s14_s14]   ;;  %s84_s21 = smov 48   ;;  %v70_v4 = vld [vmem:[%s129_s0 + $0x4] ss:$8 sm:%s28_s15]  }
   0x4   :  { %v71_v2 = vld [vmem:[%s129_s0 + $0x3] ss:$8 sm:%s35_s16]   ;;  %s42_s24 = smov 3  ;;  %s85_s25 = smov 96  }
   0x5   :  { %37 = vrot.lane.b32.xlu2 %v71_v2, %s84_s21  ;;  %s86_s26 = smov 64   ;;  %s49_s27 = smov 3  ;;  %v72_v5 = vld [vmem:[%s129_s0 + $0x2] ss:$8 sm:%s42_s24]  }
   0x6   :  { %v73_v6 = vld [vmem:[%s129_s0 + $0x1] ss:$8 sm:%s49_s27]   ;;  %s87_s3 = smov 32   ;;  %s88_s4 = smov 16  }
   0x7   :  { %s2_s5 = smov 3 }
   0x8   :  { %v3_v7 = vld [vmem:[%s129_s0] ss:$8 sm:%s2_s5]  }
   0x9   :  { %5 = vst.msk [vmem:[#allocation0] ss:$8 sm:$0x3] %vm4_vm0, %v3_v7  }
   0xa   :  { %16 = vrot.lane.b32.xlu0 %v68_v3, %s85_s25  ;;  %30 = vrot.lane.b32.xlu1 %v70_v4, %s86_s26 }
   0xd   :  { %44 = vrot.lane.b32.xlu2 %v72_v5, %s87_s3 }
  0x12   :  { %51 = vrot.lane.b32.xlu0 %v73_v6, %s88_s4 }
  0x5f   :  { %v38_v8 = vpop.permute.xlu2 %37  }
  0x67   :  { %v45_v9 = vpop.permute.xlu2 %44  }
  0x74   :  { %v10_v10 = vpop.permute.xlu0 %9   ;;  %v24_v11 = vpop.permute.xlu1 %23  }
  0x75   :  { %12 = vst.msk [vmem:[#allocation0] ss:$8 sm:$0x3] %vm11_vm1, %v10_v10  }
  0x7c   :  { %v17_v12 = vpop.permute.xlu0 %16   ;;  %v31_v13 = vpop.permute.xlu1 %30  }
  0x7d   :  { %19 = vst.msk [vmem:[#allocation0] ss:$8 sm:$0x3] %vm18_vm2, %v17_v12  }
  0x7e   :  { %26 = vst.msk [vmem:[#allocation0] ss:$8 sm:$0x3] %vm25_vm3, %v24_v11  }
  0x7f   :  { %33 = vst.msk [vmem:[#allocation0] ss:$8 sm:$0x3] %vm32_vm4, %v31_v13  }
  0x80   :  { %40 = vst.msk [vmem:[#allocation0] ss:$8 sm:$0x3] %vm39_vm5, %v38_v8  }
  0x81   :  { %47 = vst.msk [vmem:[#allocation0] ss:$8 sm:$0x3] %vm46_vm6, %v45_v9  }
  0x84   :  { %v52_v14 = vpop.permute.xlu0 %51  }
  0x85   :  { %54 = vst.msk [vmem:[#allocation0] ss:$8 sm:$0x3] %vm53_vm7, %v52_v14  }
  0x8c   :  { %v57_v15 = vld [vmem:[#allocation0] sm:$0x1]  ;;  %v62_v16 = vld [vmem:[#allocation0 + $0x8] sm:$0x1] }
  0x8d   :  { %60 = vst [vmem:[%s130_s1] sm:$0x1] %v57_v15 }
  0x8e   :  { %74 = vst [vmem:[%s130_s1 + $0x1] sm:$0x1] %v62_v16 }

// kernel: mobilenet_layer.1
= control target key start
LH: loop header
LB: loop body
LE: loop exit
PB: predicated region body
PF: predicated region fallthrough
CT: control target
= control target key end

     0   :  { %s746_s18 = smov 0   ;;  %s748_s19 = smov 0   ;;  %s976_s0 = inlined_call_operand.vmem [shape: f32[2,3,16,144], index: 0, kind: input, shape index: {}]   ;;  %s977_s1 = inlined_call_operand.vmem [shape: f32[9,128], index: 1, kind: input, shape index: {}]   ;;  %s978_s2 = inlined_call_operand.vmem [shape: f32[1,128], index: 2, kind: input, shape index: {}]   ;;  %s979_s3 = inlined_call_operand.vmem [shape: f32[128,256], index: 3, kind: input, shape index: {}]   ;;  %s980_s4 = inlined_call_operand.vmem [shape: f32[1,256], index: 4, kind: input, shape index: {}]   ;;  %s981_s5 = inlined_call_operand.vmem [shape: f32[2,16,256], index: 5, kind: output, shape index: {}]  }
   0x1   :  { %s750_s20 = smov 0   ;;  %s752_s21 = smov 0  }
   0x2   :  { %s754_s22 = smov 0   ;;  %s756_s23 = smov 0  }
   0x3   :  { %s758_s24 = smov 0  }
   0x4 LB: > { %s24_s25 = sadd.s32 1, %s702_s22  ;;  %s27_s26 = sadd.s32 1, %s706_s23  ;;  %s710_s24 = sphi %s758_s24, %s15_s24   ;;  %s706_s23 = sphi %s756_s23, %s987_s23   ;;  %s702_s22 = sphi %s754_s22, %s986_s22   ;;  %s698_s21 = sphi %s752_s21, %s985_s21   ;;  %s694_s20 = sphi %s750_s20, %s984_s20   ;;  %s690_s19 = sphi %s748_s19, %s983_s19   ;;  %s686_s18 = sphi %s746_s18, %s982_s18  }
   0x5   : > { %p25_p0 = scmp.ge.s32.totalorder %s24_s25, 2  ;;  %p43_p1 = scmp.ne.s32.totalorder %s690_s19, %s686_s18 }
   0x6   : > { %p44_p2 = scmp.eq.s32.totalorder %s710_s24, 0  ;;  %s36_s30 = sadd.s32 1, %s690_s19 }
   0x7   : > { %s989_s25 = smov (%p25_p0, %s24_s25), 0  ;;  %s991_s26 = smov (!%p25_p0, %s27_s26), %s706_s23 }
   0x8   : > { %p45_p3 = por %p44_p2, %p43_p1  ;;  %p29_p4 = scmp.ge.s32.totalorder %s991_s26, 2 }
   0x9   : > { %s32_s27 = ssub.s32 %s702_s22, %s989_s25  ;;  %p582_p6 = scmp.ge.s32.totalorder %s710_s24, 4 }
   0xa   : > { %s993_s26 = smov (%p29_p4, %s991_s26), 0 }
   0xb   : > { %s31_s28 = ssub.s32 %s706_s23, %s993_s26  ;;  %193 = sbr.rel (%p582_p6) target bundleno = 30 (0x1e), region = 32 }
   0xc   : > { %s33_s29 = sor.u32 %s32_s27, %s31_s28 }
   0xd   : > { %p34_p5 = scmp.eq.s32.totalorder %s33_s29, 0 }
   0xf   : > { %s797_s6 = scalar_select %p34_p5, %s690_s19, %s36_s30  }
  0x10   : > { %196 = sbr.rel (!%p45_p3) target bundleno = 30 (0x1e), region = 36  ;;  %s198_s7 = sand.u32 (%p45_p3), 1, %s690_s19  }
  0x11   : > { %s591_s8 = smul.u32 (%p45_p3), 48, %s198_s7  ;;  %s583_s9 = sshll.u32 (%p45_p3), %s702_s22, 1 }
  0x12   : > { %s592_s10 = smul.u32 (%p45_p3), 12, %s706_s23 }
  0x13   : > { %s200_s16 = scalar_lea.vmem (%p45_p3), [#allocation2], %s591_s8 }
  0x14   : > { %s203_s11 = sadd.s32 (%p45_p3), %s592_s10, %s583_s9 }
  0x15   : > { %s584_s12 = sshll.u32 %s203_s11, 3 }
  0x16   : > { %s205_s15 = scalar_lea.vmem %s976_s0, %s584_s12 }
  0x17   : > { %v218_v0 = vld [vmem:[%s205_s15] sm:$0xff]  ;;  %v220_v1 = vld [vmem:[%s205_s15 + $0x8] sm:$0xff] }
  0x18   : > { %v222_v2 = vld [vmem:[%s205_s15 + $0x20] sm:$0xff]  ;;  %219 = vst [vmem:[%s200_s16] sm:$0xff] %v218_v0  ;;  %v224_v3 = vld [vmem:[%s205_s15 + $0x28] sm:$0xff] }
  0x19   : > { %221 = vst [vmem:[%s200_s16 + $0x8] sm:$0xff] %v220_v1  ;;  %v226_v4 = vld [vmem:[%s205_s15 + $0x40] sm:$0xff]  ;;  %v228_v5 = vld [vmem:[%s205_s15 + $0x48] sm:$0xff] }
  0x1a   : > { %223 = vst [vmem:[%s200_s16 + $0x10] sm:$0xff] %v222_v2 }
  0x1b   : > { %225 = vst [vmem:[%s200_s16 + $0x18] sm:$0xff] %v224_v3 }
  0x1c   : > { %227 = vst [vmem:[%s200_s16 + $0x20] sm:$0xff] %v226_v4 }
  0x1d   : > { %229 = vst [vmem:[%s200_s16 + $0x28] sm:$0xff] %v228_v5 }
  0x1e PF: > { %p585_p7 = scmp.ge.s32.totalorder %s710_s24, 1  ;;  %p234_p8 = scmp.lt.s32.totalorder %s710_s24, 5 }
  0x20   : > { %p235_p9 = pnand %p585_p7, %p234_p8 }
  0x21   : > { %s712_s28 = smov (!%p235_p9), 8   ;;  %s713_s7 = smov (!%p235_p9), 16  }
  0x22   : > { %238 = sbr.rel (%p235_p9) target bundleno = 440 (0x1b8), region = 59  ;;  %s241_s8 = sand.u32 (!%p235_p9), 1, %s686_s18  }
  0x23   : > { %s593_s9 = smul.u32 (!%p235_p9), 48, %s241_s8  ;;  %s714_s11 = smov (!%p235_p9), 120  }
  0x24   : > { %s715_s18 = smov (!%p235_p9), 112   ;;  %p272_p10 = scmp.lt.s32.totalorder (!%p235_p9), %s698_s21, 1 }
  0x25   : > { %s243_s10 = scalar_lea.vmem (!%p235_p9), [#allocation2], %s593_s9  ;;  %p274_p11 = scmp.lt.s32.totalorder (!%p235_p9), %s694_s20, 1 }
  0x27   : > { %v811_v6 = vld [vmem:[%s977_s1] sm:$0xff]  ;;  %v654_v12 = vld [vmem:[%s977_s1 + $0x8] ss:$0 sm:$0xff]  ;;  %v432_v37 = vld [vmem:[%s979_s3 + $0xf0] sm:$0xff]  ;;  %vm305_vm0 = vcmask 982016   ;;  %vm322_vm1 = vcmask 916480  }
  0x28   : > { %v292_v7 = vperm.slane %v811_v6, 1  ;;  %v329_v8 = vperm.slane %v811_v6, 4  ;;  %v364_v9 = vperm.slane %v811_v6, 7  ;;  %v309_v10 = vperm.slane %v811_v6, 2  ;;  %v822_v13 = vld [vmem:[%s243_s10] sm:$0xff]  ;;  %v282_v14 = vld [vmem:[%s243_s10 + $0x8] sm:$0xff]  ;;  %440 = vmatpush.msra.mxu0 %v432_v37 }
  0x29   : > { %v345_v11 = vperm.slane %v811_v6, 5  ;;  %v825_v19 = vld [vmem:[%s243_s10 + $0x10] sm:$0xff]  ;;  %v284_v26 = vld [vmem:[%s243_s10 + $0x18] sm:$0xff]  ;;  %v830_v31 = vld [vmem:[%s243_s10 + $0x20] sm:$0xff]  ;;  %s995_s21 = smov (!%p272_p10, %s698_s21), 1  ;;  %s997_s20 = smov (!%p274_p11, %s694_s20), 1 }
  0x2a   : > { %294 = vrot.lane.b32.xlu0 %v292_v7, %s712_s28  ;;  %331 = vrot.lane.b32.xlu1 %v329_v8, %s712_s28  ;;  %v286_v32 = vld [vmem:[%s243_s10 + $0x28] sm:$0xff]  ;;  %v430_v39 = vld [vmem:[%s979_s3 + $0xe0] sm:$0xff]  ;;  %v289_v8 = vperm.slane %v811_v6, 0  ;;  %s586_s14 = sshll.u32 %s997_s20, 1  ;;  %s587_s15 = sshll.u32 %s995_s21, 2 }
  0x2b   : > { %366 = vrot.lane.b32.xlu2 %v364_v9, %s712_s28  ;;  %v433_v38 = vld [vmem:[%s979_s3 + $0xf8] sm:$0xff]  ;;  %v431_v40 = vld [vmem:[%s979_s3 + $0xe8] sm:$0xff]  ;;  %v428_v41 = vld [vmem:[%s979_s3 + $0xd0] sm:$0xff]  ;;  %441 = vmatpush.msra.mxu0 %v430_v39  ;;  %s278_s27 = sadd.s32 %s587_s15, %s586_s14 }
  0x2c   : > { %460 = vmatpush.msra.mxu1 %v433_v38  ;;  %v429_v42 = vld [vmem:[%s979_s3 + $0xd8] sm:$0xff]  ;;  %v426_v43 = vld [vmem:[%s979_s3 + $0xc0] sm:$0xff]  ;;  %v427_v44 = vld [vmem:[%s979_s3 + $0xc8] sm:$0xff]  ;;  %s588_s28 = sshll.u32 %s278_s27, 3 }
  0x2d   : > { %442 = vmatpush.msra.mxu0 %v428_v41  ;;  %v424_v45 = vld [vmem:[%s979_s3 + $0xb0] sm:$0xff]  ;;  %v425_v46 = vld [vmem:[%s979_s3 + $0xb8] sm:$0xff]  ;;  %v422_v47 = vld [vmem:[%s979_s3 + $0xa0] sm:$0xff] }
  0x2e   : > { %461 = vmatpush.msra.mxu1 %v431_v40  ;;  %v423_v48 = vld [vmem:[%s979_s3 + $0xa8] sm:$0xff]  ;;  %v420_v49 = vld [vmem:[%s979_s3 + $0x90] sm:$0xff]  ;;  %v421_v50 = vld [vmem:[%s979_s3 + $0x98] sm:$0xff] }
  0x2f   : > { %443 = vmatpush.msra.mxu0 %v426_v43  ;;  %v418_v51 = vld [vmem:[%s979_s3 + $0x80] sm:$0xff]  ;;  %v419_v52 = vld [vmem:[%s979_s3 + $0x88] sm:$0xff]  ;;  %v416_v53 = vld [vmem:[%s979_s3 + $0x70] sm:$0xff] }
  0x30   : > { %462 = vmatpush.msra.mxu1 %v429_v42  ;;  %v417_v54 = vld [vmem:[%s979_s3 + $0x78] sm:$0xff]  ;;  %v414_v55 = vld [vmem:[%s979_s3 + $0x60] sm:$0xff]  ;;  %v415_v56 = vld [vmem:[%s979_s3 + $0x68] sm:$0xff] }
  0x31   : > { %444 = vmatpush.msra.mxu0 %v424_v45  ;;  %v412_v57 = vld [vmem:[%s979_s3 + $0x50] sm:$0xff]  ;;  %v413_v58 = vld [vmem:[%s979_s3 + $0x58] sm:$0xff]  ;;  %v410_v59 = vld [vmem:[%s979_s3 + $0x40] sm:$0xff] }
  0x32   : > { %311 = vrot.lane.b32.xlu0 %v309_v10, %s713_s7  ;;  %347 = vrot.lane.b32.xlu1 %v345_v11, %s713_s7  ;;  %v411_v60 = vld [vmem:[%s979_s3 + $0x48] sm:$0xff]  ;;  %v408_v61 = vld [vmem:[%s979_s3 + $0x30] sm:$0xff]  ;;  %v326_v10 = vperm.slane %v811_v6, 3  ;;  %v290_v11 = vmul.f32 %v289_v8, %v822_v13 }
  0x33   : > { %382 = vrot.lane.b32.xlu2 %v654_v12, %s713_s7  ;;  %463 = vmatpush.msra.mxu1 %v427_v44  ;;  %v409_v62 = vld [vmem:[%s979_s3 + $0x38] sm:$0xff]  ;;  %v406_v63 = vld [vmem:[%s979_s3 + $0x20] sm:$0xff]  ;;  %v407_v0 = vld [vmem:[%s979_s3 + $0x28] sm:$0xff]  ;;  %s280_s7 = scalar_lea.vmem %s981_s5, %s588_s28 }
  0x34   : > { %445 = vmatpush.msra.mxu0 %v422_v47  ;;  %v404_v2 = vld [vmem:[%s979_s3 + $0x10] sm:$0xff]  ;;  %v405_v3 = vld [vmem:[%s979_s3 + $0x18] sm:$0xff]  ;;  %v402_v4 = vld [vmem:[%s979_s3] sm:$0xff] }
  0x35   : > { %464 = vmatpush.msra.mxu1 %v425_v46  ;;  %v403_v5 = vld [vmem:[%s979_s3 + $0x8] sm:$0xff]  ;;  %v434_v40 = vld [vmem:[%s980_s4] sm:$0x3] }
  0x36   : > { %446 = vmatpush.msra.mxu0 %v420_v49  ;;  %v436_v41 = vperm.slane %v434_v40, 0  ;;  %v437_v42 = vperm.slane %v434_v40, 1 }
  0x37   : > { %465 = vmatpush.msra.mxu1 %v423_v48 }
  0x38   : > { %447 = vmatpush.msra.mxu0 %v418_v51 }
  0x39   : > { %466 = vmatpush.msra.mxu1 %v421_v50 }
  0x3a   : > { %448 = vmatpush.msra.mxu0 %v416_v53 }
  0x3b   : > { %467 = vmatpush.msra.mxu1 %v419_v52 }
  0x3c   : > { %449 = vmatpush.msra.mxu0 %v414_v55 }
  0x3d   : > { %468 = vmatpush.msra.mxu1 %v417_v54 }
  0x3e   : > { %450 = vmatpush.msra.mxu0 %v412_v57 }
  0x3f   : > { %469 = vmatpush.msra.mxu1 %v415_v56 }
  0x40   : > { %451 = vmatpush.msra.mxu0 %v410_v59 }
  0x41   : > { %470 = vmatpush.msra.mxu1 %v413_v58 }
  0x42   : > { %452 = vmatpush.msra.mxu0 %v408_v61 }
  0x43   : > { %471 = vmatpush.msra.mxu1 %v411_v60 }
  0x44   : > { %453 = vmatpush.msra.mxu0 %v406_v63 }
  0x45   : > { %472 = vmatpush.msra.mxu1 %v409_v62 }
  0x46   : > { %454 = vmatpush.msra.mxu0 %v404_v2 }
  0x47   : > { %473 = vmatpush.msra.mxu1 %v407_v0 }
  0x48   : > { %455 = vmatpush.msra.mxu0 %v402_v4 }
  0x49   : > { %474 = vmatpush.msra.mxu1 %v405_v3 }
  0x4b   : > { %475 = vmatpush.msra.mxu1 %v403_v5 }
  0x85   : > { %v367_v24 = vpop.permute.xlu2 %366 }
  0x86   : > { %v369_v34 = vmul.f32 %v367_v24, %v830_v31  ;;  %v370_v35 = vmul.f32 %v367_v24, %v286_v32 }
  0x8d   : > { %v383_v30 = vpop.permute.xlu2 %382 }
  0x8e   : > { %v385_v33 = vmul.f32 %v383_v30, %v830_v31  ;;  %v386_v36 = vmul.f32 %v383_v30, %v286_v32 }
  0x9c   : > { %v295_v15 = vpop.permute.xlu0 %294  ;;  %v332_v18 = vpop.permute.xlu1 %331 }
  0x9d   : > { %v297_v16 = vmul.f32 %v295_v15, %v822_v13  ;;  %v298_v17 = vmul.f32 %v295_v15, %v282_v14  ;;  %v334_v20 = vmul.f32 %v332_v18, %v825_v19  ;;  %v335_v29 = vmul.f32 %v332_v18, %v284_v26 }
  0x9f   : > { %303 = vrot.lane.b32.xlu1 %v298_v17, %s714_s11  ;;  %301 = vrot.lane.b32.xlu0 %v297_v16, %s714_s11  ;;  %v327_v16 = vmul.f32 %v326_v10, %v825_v19 }
  0xa4   : > { %v312_v21 = vpop.permute.xlu0 %311  ;;  %v348_v25 = vpop.permute.xlu1 %347 }
  0xa5   : > { %v314_v22 = vmul.f32 %v312_v21, %v822_v13  ;;  %v315_v23 = vmul.f32 %v312_v21, %v282_v14  ;;  %v351_v27 = vmul.f32 %v348_v25, %v284_v26  ;;  %v350_v28 = vmul.f32 %v348_v25, %v825_v19 }
  0xa7   : > { %338 = vrot.lane.b32.xlu1 %v334_v20, %s714_s11  ;;  %318 = vrot.lane.b32.xlu2 %v314_v22, %s715_s18  ;;  %v361_v22 = vperm.slane %v811_v6, 6 }
  0xa8   : > { %320 = vrot.lane.b32.xlu0 %v315_v23, %s715_s18 }
  0xa9   : > { %v362_v13 = vmul.f32 %v361_v22, %v830_v31  ;;  %v655_v31 = vld [vmem:[%s978_s2] ss:$0 sm:$0xff] }
  0xaf   : > { %356 = vrot.lane.b32.xlu1 %v351_v27, %s715_s18  ;;  %340 = vrot.lane.b32.xlu2 %v335_v29, %s714_s11 }
  0xb0   : > { %354 = vrot.lane.b32.xlu0 %v350_v28, %s715_s18 }
  0xb7   : > { %389 = vrot.lane.b32.xlu1 %v385_v33, %s715_s18  ;;  %373 = vrot.lane.b32.xlu2 %v369_v34, %s714_s11 }
  0xb8   : > { %375 = vrot.lane.b32.xlu0 %v370_v35, %s714_s11 }
  0xbf   : > { %391 = vrot.lane.b32.xlu2 %v386_v36, %s715_s18 }
 0x101   : > { %v319_v1 = vpop.permute.xlu2 %318 }
 0x109   : > { %v341_v14 = vpop.permute.xlu2 %340 }
 0x111   : > { %v304_v7 = vpop.permute.xlu1 %303  ;;  %v302_v9 = vpop.permute.xlu0 %301 }
 0x112   : > { %v306_v12 = vsel %vm305_vm0, %v302_v9, %v304_v7  ;;  %v374_v26 = vpop.permute.xlu2 %373 }
 0x113   : > { %v308_v17 = vadd.f32 %v306_v12, %v290_v11 }
 0x119   : > { %v339_v15 = vpop.permute.xlu1 %338 }
 0x11a   : > { %v321_v18 = vpop.permute.xlu0 %320  ;;  %v342_v24 = vsel %vm305_vm0, %v339_v15, %v341_v14  ;;  %v392_v34 = vpop.permute.xlu2 %391 }
 0x11b   : > { %v323_v20 = vsel %vm322_vm1, %v319_v1, %v321_v18 }
 0x11c   : > { %v325_v21 = vadd.f32 %v323_v20, %v308_v17 }
 0x11e   : > { %v328_v23 = vadd.f32 %v327_v16, %v325_v21 }
 0x120   : > { %v344_v28 = vadd.f32 %v342_v24, %v328_v23 }
 0x121   : > { %v357_v25 = vpop.permute.xlu1 %356 }
 0x122   : > { %v355_v27 = vpop.permute.xlu0 %354 }
 0x123   : > { %v358_v29 = vsel %vm322_vm1, %v355_v27, %v357_v25 }
 0x124   : > { %v360_v19 = vadd.f32 %v358_v29, %v344_v28 }
 0x126   : > { %v363_v30 = vadd.f32 %v362_v13, %v360_v19 }
 0x129   : > { %v390_v32 = vpop.permute.xlu1 %389 }
 0x12a   : > { %v376_v33 = vpop.permute.xlu0 %375  ;;  %v393_v36 = vsel %vm322_vm1, %v390_v32, %v392_v34 }
 0x12b   : > { %v377_v6 = vsel %vm305_vm0, %v374_v26, %v376_v33 }
 0x12c   : > { %v379_v35 = vadd.f32 %v377_v6, %v363_v30 }
 0x12e   : > { %v395_v37 = vadd.f32 %v393_v36, %v379_v35 }
 0x130   : > { %v400_v38 = vadd.f32 %v655_v31, %v395_v37 }
 0x132   : > { %v401_v39 = vmax.f32 %v400_v38, 0.0 }
 0x134   : > { %456 = vmatmul.f32.vlgmr.msra.gmra.mxu0 %v401_v39  ;;  %476 = vmatmul.f32.vlgmr.msra.gmra.mxu1 %v401_v39 }
 0x1b1   : > { %v457_v43 = vpop.f32.mrf.mxu0  ;;  %v477_v44 = vpop.f32.mrf.mxu1 }
 0x1b2   : > { %v458_v45 = vadd.f32 %v457_v43, %v436_v41  ;;  %v478_v46 = vadd.f32 %v477_v44, %v437_v42 }
 0x1b4   : > { %v480_v47 = vmax.f32 %v458_v45, 0.0  ;;  %v481_v48 = vmax.f32 %v478_v46, 0.0 }
 0x1b6   : > { %482 = vst [vmem:[%s280_s7] sm:$0xff] %v480_v47 }
 0x1b7   : > { %483 = vst [vmem:[%s280_s7 + $0x8] sm:$0xff] %v481_v48 }
 0x1b8 PF: > { %s15_s24 = sadd.s32 1, %s710_s24   ;;  %s982_s18 = smov %s690_s19 }
 0x1b9   : > { %p12_p12 = scmp.ge.s32.totalorder %s15_s24, 6   ;;  %s983_s19 = smov %s797_s6 }
 0x1ba   : > { %s984_s20 = smov %s702_s22  ;;  %s985_s21 = smov %s706_s23 }
 0x1bb   : > { %s986_s22 = smov %s989_s25  ;;  %s987_s23 = smov %s993_s26 }
 0x1bc   :  { %14 = sbr.rel (!%p12_p12) target bundleno = 4 (0x4), region = 98 }

</bundles_post_ra>
